<compile_context>
chip_gen: v6e
topology: v6e:2x2x1
jax: 0.10.0
libtpu: 0.0.40
codegen_flags: <defaults>
</compile_context>

<pallas_src>
import functools

import jax
import jax.numpy as jnp
from jax import lax
from jax.experimental import pallas as pl
from jax.experimental.pallas import tpu as pltpu

_LANE = 128        # lane width: pad matmul N dims to this
_ROW_CHUNK = 512   # inner compute chunk (f32 intermediates stay ~256 KiB each)


def _round_up(x: int, m: int) -> int:
    return ((x + m - 1) // m) * m


def _pad2(a, rows, cols, dtype):
    out = jnp.zeros((rows, cols), dtype)
    return out.at[: a.shape[0], : a.shape[1]].set(a.astype(dtype))


def prepare_params(params, compute_dtype=jnp.bfloat16):
    """Pad/cast the weights ONCE (not per forward call).

    Only the N (output-feature) dims are lane-padded to 128; K dims are kept
    unpadded where possible (D_in stays as-is; H/H2 become K=128 for the next
    layer only because they were padded as the previous layer's N).  Biases
    stay f32 (elementwise work is f32 on every TPU generation).
    """
    d_in, h = params["W1"].shape
    h2 = params["W2"].shape[1]
    d_out = params["W3"].shape[1]
    h_p, h2_p, d_out_p = (_round_up(d, _LANE) for d in (h, h2, d_out))
    return {
        "W1": _pad2(params["W1"], d_in, h_p, compute_dtype),
        "b1": _pad2(params["b1"], 1, h_p, jnp.float32),
        "W2": _pad2(params["W2"], h_p, h2_p, compute_dtype),
        "b2": _pad2(params["b2"], 1, h2_p, jnp.float32),
        "W3": _pad2(params["W3"], h2_p, d_out_p, compute_dtype),
        "b3": _pad2(params["b3"], 1, d_out_p, jnp.float32),
    }


def _mlp_kernel(x_ref, w1_ref, b1_ref, w2_ref, b2_ref, w3_ref, b3_ref, o_ref,
                *, row_chunk, d_out):
    w1 = w1_ref[...]
    b1 = b1_ref[...]
    w2 = w2_ref[...]
    b2 = b2_ref[...]
    w3 = w3_ref[...]
    b3 = b3_ref[...]

    def compute(xc):
        # fc1 + ReLU: cast x to the weight dtype right before the MXU push;
        # accumulate + elementwise in f32 (v5e VPU has no bf16).
        h1 = jnp.dot(xc.astype(w1.dtype), w1, preferred_element_type=jnp.float32)
        h1 = jnp.maximum(h1 + b1, 0.0)
        # fc2 + ReLU
        h2 = jnp.dot(h1.astype(w2.dtype), w2, preferred_element_type=jnp.float32)
        h2 = jnp.maximum(h2 + b2, 0.0)
        # fc3 + sigmoid: only the real output columns are kept/stored.
        logits = jnp.dot(h2.astype(w3.dtype), w3,
                         preferred_element_type=jnp.float32) + b3
        return jax.nn.sigmoid(logits[:, :d_out])

    n_chunks = x_ref.shape[0] // row_chunk
    if n_chunks == 1:
        o_ref[...] = compute(x_ref[...]).astype(o_ref.dtype)
    else:
        # Big streaming block (amortizes per-grid-step overhead) processed in
        # row_chunk pieces so live f32 intermediates stay small in VMEM.
        def body(c, carry):
            r = pl.multiple_of(c * row_chunk, row_chunk)
            o_ref[pl.ds(r, row_chunk), :] = compute(
                x_ref[pl.ds(r, row_chunk), :]).astype(o_ref.dtype)
            return carry

        lax.fori_loop(0, n_chunks, body, 0)


def _choose_tile_m(B: int) -> int:
    """Pick the streamed batch-block size.

    Targets >= ~1 MiB of x per grid step (cap 4096 f32 rows at D_in=64), keeps
    >= 2 (preferably even) grid steps at large batch so v7x's two TensorCores
    both get work, and avoids any batch padding for tiny batches.
    """
    cap = 4096
    n_blocks = max(1, pl.cdiv(B, cap))
    if B >= 32:
        n_blocks = max(n_blocks, 2)
        if n_blocks % 2:
            n_blocks += 1
    t = pl.cdiv(B, n_blocks)
    if t > _ROW_CHUNK:
        return _round_up(t, _ROW_CHUNK)   # tile = whole number of row chunks
    t8 = _round_up(t, 8)
    if B % t8 == 0:
        return t8                          # exact split: no batch padding at all
    return _round_up(t, 16)                # 16-row granule (bf16 sublane packing)


def aesthetic_classifier_forward(x, prepared, *, output_size=1, tile_m=None):
    """x: (B, input_size) float32.  prepared: output of prepare_params()."""
    B, d_in = x.shape
    w1, b1 = prepared["W1"], prepared["b1"]
    w2, b2 = prepared["W2"], prepared["b2"]
    w3, b3 = prepared["W3"], prepared["b3"]
    assert w1.shape[0] == d_in, (w1.shape, d_in)
    h_p, h2_p, d_out_p = w1.shape[1], w2.shape[1], w3.shape[1]
    d_out = int(output_size)

    # --- batch tiling ---
    if tile_m is None:
        tile_m = _choose_tile_m(B)
    tile_m = max(8, _round_up(int(tile_m), 8))
    row_chunk = min(tile_m, _ROW_CHUNK)
    if tile_m % row_chunk:
        tile_m = _round_up(tile_m, row_chunk)
    grid_m = pl.cdiv(B, tile_m)
    B_p = grid_m * tile_m

    # Only pad the batch (rows) when the grid doesn't divide it exactly; no
    # feature-dim padding and no dtype cast here (done in-kernel, hidden under DMA).
    x_in = x if B_p == B else jnp.pad(x, ((0, B_p - B), (0, 0)))

    # --- cost estimate reflecting the real HBM footprint ---
    w_item = jnp.dtype(w1.dtype).itemsize
    x_item = jnp.dtype(x.dtype).itemsize
    flops = 2 * B_p * (d_in * h_p + h_p * h2_p + h2_p * d_out_p)
    bytes_accessed = (
        B_p * d_in * x_item                                    # x stream (unpadded)
        + (d_in * h_p + h_p * h2_p + h2_p * d_out_p) * w_item  # resident weights
        + (h_p + h2_p + d_out_p) * 4                           # biases
        + B_p * d_out * 4                                      # real output only
    )
    cost = pl.CostEstimate(flops=int(flops),
                           transcendentals=int(B_p * d_out),
                           bytes_accessed=int(bytes_accessed))

    in_specs = [
        pl.BlockSpec((tile_m, d_in), lambda i: (i, 0)),      # x: tiled batch, full D_in
        pl.BlockSpec((d_in, h_p), lambda i: (0, 0)),         # weights/biases resident
        pl.BlockSpec((1, h_p), lambda i: (0, 0)),
        pl.BlockSpec((h_p, h2_p), lambda i: (0, 0)),
        pl.BlockSpec((1, h2_p), lambda i: (0, 0)),
        pl.BlockSpec((h2_p, d_out_p), lambda i: (0, 0)),
        pl.BlockSpec((1, d_out_p), lambda i: (0, 0)),
    ]
    out_spec = pl.BlockSpec((tile_m, d_out), lambda i: (i, 0))

    kernel = functools.partial(_mlp_kernel, row_chunk=row_chunk, d_out=d_out)

    # VMEM budget (worst case, tile_m=4096): 2 x 1 MiB x-block + ~0.2 MiB weights
    # + ~0.8 MiB f32 intermediates per row chunk  =>  well under the 16 MiB v5e
    # scoped default, so no vmem_limit_bytes override is needed.
    out_padded = pl.pallas_call(
        kernel,
        out_shape=jax.ShapeDtypeStruct((B_p, d_out), jnp.float32),
        grid_spec=pltpu.PrefetchScalarGridSpec(
            num_scalar_prefetch=0,
            grid=(grid_m,),
            in_specs=in_specs,
            out_specs=out_spec,
        ),
        compiler_params=pltpu.CompilerParams(
            dimension_semantics=("parallel",),
        ),
        cost_estimate=cost,
    )(x_in, w1, b1, w2, b2, w3, b3)

    return out_padded if B_p == B else out_padded[:B]


def init_params(key, input_size, hidden_size, output_size, dtype=jnp.float32):
    """Deterministic synthetic init matching the PyTorch module's shapes.
    PyTorch nn.Linear stores weight as (out, in); we store the transpose (in, out)."""
    ks = jax.random.split(key, 6)

    def linear(kw, kb, fan_in, fan_out):
        bound = 1.0 / float(jnp.sqrt(jnp.float32(fan_in)))
        W = jax.random.uniform(kw, (fan_in, fan_out), dtype, -bound, bound)
        b = jax.random.uniform(kb, (1, fan_out), dtype, -bound, bound)
        return W, b

    W1, b1 = linear(ks[0], ks[1], input_size, hidden_size)
    W2, b2 = linear(ks[2], ks[3], hidden_size, hidden_size // 2)
    W3, b3 = linear(ks[4], ks[5], hidden_size // 2, output_size)
    return {"W1": W1, "b1": b1, "W2": W2, "b2": b2, "W3": W3, "b3": b3}


def reference_forward(x, p):
    h1 = jnp.maximum(x @ p["W1"] + p["b1"], 0.0)
    h2 = jnp.maximum(h1 @ p["W2"] + p["b2"], 0.0)
    return jax.nn.sigmoid(h2 @ p["W3"] + p["b3"])


if __name__ == "__main__":
    # Small shapes consistent with the module: batch=8, input=64, hidden=32, output=1.
    B, INPUT_SIZE, HIDDEN_SIZE, OUTPUT_SIZE = 8, 64, 32, 1

    key = jax.random.PRNGKey(0)
    k_x, k_p = jax.random.split(key)
    x = jax.random.normal(k_x, (B, INPUT_SIZE), dtype=jnp.float32)
    params = init_params(k_p, INPUT_SIZE, HIDDEN_SIZE, OUTPUT_SIZE)

    ref = reference_forward(x, params)

    # f32 compute path (weights kept f32): tight check vs the f32 reference
    # (both sides use the TPU's default matmul precision).
    prepared_f32 = prepare_params(params, compute_dtype=jnp.float32)
    out_f32 = jax.block_until_ready(
        aesthetic_classifier_forward(x, prepared_f32, output_size=OUTPUT_SIZE))
    assert out_f32.shape == (B, OUTPUT_SIZE), out_f32.shape
    assert jnp.allclose(out_f32, ref, atol=2e-3, rtol=2e-3), "f32 path mismatch"

    # Default bf16-weight path (f32 accumulate): relaxed tolerance vs f32 reference.
    prepared_bf16 = prepare_params(params, compute_dtype=jnp.bfloat16)
    out_bf16 = jax.block_until_ready(
        aesthetic_classifier_forward(x, prepared_bf16, output_size=OUTPUT_SIZE))
    assert out_bf16.shape == (B, OUTPUT_SIZE), out_bf16.shape
    assert jnp.allclose(out_bf16, ref, atol=2e-2, rtol=2e-2), "bf16 path mismatch"

    print("KERNEL_OK")
</pallas_src>

<mosaic_0001>
module attributes {stable_mosaic.version = 11 : i64} {
  func.func @_mlp_kernel(%arg0: i32, %arg1: memref<8x64xf32, #tpu.memory_space<vmem>>, %arg2: memref<64x128xf32, #tpu.memory_space<vmem>>, %arg3: memref<1x128xf32, #tpu.memory_space<vmem>>, %arg4: memref<128x128xf32, #tpu.memory_space<vmem>>, %arg5: memref<1x128xf32, #tpu.memory_space<vmem>>, %arg6: memref<128x128xf32, #tpu.memory_space<vmem>>, %arg7: memref<1x128xf32, #tpu.memory_space<vmem>>, %arg8: memref<8x1xf32, #tpu.memory_space<vmem>>) attributes {dimension_semantics = [#tpu.dimension_semantics<parallel>], iteration_bounds = array<i64: 1>, scalar_prefetch = 0 : i64, scratch_operands = 0 : i64, tpu.core_type = #tpu.core_type<tc>, window_params = [{transform_indices = @transform_0, window_bounds = array<i64: 8, 64>}, {pipeline_mode = #tpu.pipeline_mode<synchronous>, transform_indices = @transform_1, window_bounds = array<i64: 64, 128>}, {pipeline_mode = #tpu.pipeline_mode<synchronous>, transform_indices = @transform_2, window_bounds = array<i64: 1, 128>}, {pipeline_mode = #tpu.pipeline_mode<synchronous>, transform_indices = @transform_3, window_bounds = array<i64: 128, 128>}, {pipeline_mode = #tpu.pipeline_mode<synchronous>, transform_indices = @transform_4, window_bounds = array<i64: 1, 128>}, {pipeline_mode = #tpu.pipeline_mode<synchronous>, transform_indices = @transform_5, window_bounds = array<i64: 128, 128>}, {pipeline_mode = #tpu.pipeline_mode<synchronous>, transform_indices = @transform_6, window_bounds = array<i64: 1, 128>}, {transform_indices = @transform_7, window_bounds = array<i64: 8, 1>}]} {
    %c0 = arith.constant 0 : index
    %c0_0 = arith.constant 0 : index
    %0 = vector.load %arg2[%c0, %c0_0] : memref<64x128xf32, #tpu.memory_space<vmem>>, vector<64x128xf32>
    %c0_1 = arith.constant 0 : index
    %c0_2 = arith.constant 0 : index
    %1 = vector.load %arg3[%c0_1, %c0_2] : memref<1x128xf32, #tpu.memory_space<vmem>>, vector<1x128xf32>
    %c0_3 = arith.constant 0 : index
    %c0_4 = arith.constant 0 : index
    %2 = vector.load %arg4[%c0_3, %c0_4] : memref<128x128xf32, #tpu.memory_space<vmem>>, vector<128x128xf32>
    %c0_5 = arith.constant 0 : index
    %c0_6 = arith.constant 0 : index
    %3 = vector.load %arg5[%c0_5, %c0_6] : memref<1x128xf32, #tpu.memory_space<vmem>>, vector<1x128xf32>
    %c0_7 = arith.constant 0 : index
    %c0_8 = arith.constant 0 : index
    %4 = vector.load %arg6[%c0_7, %c0_8] : memref<128x128xf32, #tpu.memory_space<vmem>>, vector<128x128xf32>
    %c0_9 = arith.constant 0 : index
    %c0_10 = arith.constant 0 : index
    %5 = vector.load %arg7[%c0_9, %c0_10] : memref<1x128xf32, #tpu.memory_space<vmem>>, vector<1x128xf32>
    %c0_11 = arith.constant 0 : index
    %c0_12 = arith.constant 0 : index
    %6 = vector.load %arg1[%c0_11, %c0_12] : memref<8x64xf32, #tpu.memory_space<vmem>>, vector<8x64xf32>
    %cst = arith.constant dense<0.000000e+00> : vector<8x128xf32>
    %7 = tpu.matmul %6, %0, %cst {dimension_numbers = #tpu.dot_dimension_numbers<[1], [0], [0], [1], [0, 0, 1, 1], [], []>} : vector<8x64xf32>, vector<64x128xf32>, vector<8x128xf32> -> vector<8x128xf32>
    %8 = vector.broadcast %1 : vector<1x128xf32> to vector<8x128xf32>
    %9 = arith.addf %7, %8 : vector<8x128xf32>
    %cst_13 = arith.constant 0.000000e+00 : f32
    %10 = vector.broadcast %cst_13 : f32 to vector<8x128xf32>
    %11 = arith.maximumf %9, %10 : vector<8x128xf32>
    %cst_14 = arith.constant dense<0.000000e+00> : vector<8x128xf32>
    %12 = tpu.matmul %11, %2, %cst_14 {dimension_numbers = #tpu.dot_dimension_numbers<[1], [0], [0], [1], [0, 0, 1, 1], [], []>} : vector<8x128xf32>, vector<128x128xf32>, vector<8x128xf32> -> vector<8x128xf32>
    %13 = vector.broadcast %3 : vector<1x128xf32> to vector<8x128xf32>
    %14 = arith.addf %12, %13 : vector<8x128xf32>
    %cst_15 = arith.constant 0.000000e+00 : f32
    %15 = vector.broadcast %cst_15 : f32 to vector<8x128xf32>
    %16 = arith.maximumf %14, %15 : vector<8x128xf32>
    %cst_16 = arith.constant dense<0.000000e+00> : vector<8x128xf32>
    %17 = tpu.matmul %16, %4, %cst_16 {dimension_numbers = #tpu.dot_dimension_numbers<[1], [0], [0], [1], [0, 0, 1, 1], [], []>} : vector<8x128xf32>, vector<128x128xf32>, vector<8x128xf32> -> vector<8x128xf32>
    %18 = vector.broadcast %5 : vector<1x128xf32> to vector<8x128xf32>
    %19 = arith.addf %17, %18 : vector<8x128xf32>
    %20 = vector.extract_strided_slice %19 {offsets = [0, 0], sizes = [8, 1], strides = [1, 1]} : vector<8x128xf32> to vector<8x1xf32>
    %21 = arith.negf %20 : vector<8x1xf32>
    %22 = math.exp %21 : vector<8x1xf32>
    %cst_17 = arith.constant 1.000000e+00 : f32
    %23 = vector.broadcast %cst_17 : f32 to vector<8x1xf32>
    %24 = arith.addf %23, %22 : vector<8x1xf32>
    %25 = arith.divf %23, %24 : vector<8x1xf32>
    %c0_18 = arith.constant 0 : index
    %c0_19 = arith.constant 0 : index
    %26 = vector.load %arg8[%c0_18, %c0_19] : memref<8x1xf32, #tpu.memory_space<vmem>>, vector<8x1xf32>
    tpu.vector_store %arg8[%c0_18, %c0_19], %25 {strides = array<i32>} : memref<8x1xf32, #tpu.memory_space<vmem>>, vector<8x1xf32>,
    return
  }
  func.func @transform_0(%arg0: i32) -> (i32, i32) {
    %c0_i32 = arith.constant 0 : i32
    %c0_i32_0 = arith.constant 0 : i32
    return %arg0, %c0_i32 : i32, i32
  }
  func.func @transform_1(%arg0: i32) -> (i32, i32) {
    %c0_i32 = arith.constant 0 : i32
    %c0_i32_0 = arith.constant 0 : i32
    %c0_i32_1 = arith.constant 0 : i32
    return %c0_i32, %c0_i32_0 : i32, i32
  }
  func.func @transform_2(%arg0: i32) -> (i32, i32) {
    %c0_i32 = arith.constant 0 : i32
    %c0_i32_0 = arith.constant 0 : i32
    %c0_i32_1 = arith.constant 0 : i32
    return %c0_i32, %c0_i32_0 : i32, i32
  }
  func.func @transform_3(%arg0: i32) -> (i32, i32) {
    %c0_i32 = arith.constant 0 : i32
    %c0_i32_0 = arith.constant 0 : i32
    %c0_i32_1 = arith.constant 0 : i32
    return %c0_i32, %c0_i32_0 : i32, i32
  }
  func.func @transform_4(%arg0: i32) -> (i32, i32) {
    %c0_i32 = arith.constant 0 : i32
    %c0_i32_0 = arith.constant 0 : i32
    %c0_i32_1 = arith.constant 0 : i32
    return %c0_i32, %c0_i32_0 : i32, i32
  }
  func.func @transform_5(%arg0: i32) -> (i32, i32) {
    %c0_i32 = arith.constant 0 : i32
    %c0_i32_0 = arith.constant 0 : i32
    %c0_i32_1 = arith.constant 0 : i32
    return %c0_i32, %c0_i32_0 : i32, i32
  }
  func.func @transform_6(%arg0: i32) -> (i32, i32) {
    %c0_i32 = arith.constant 0 : i32
    %c0_i32_0 = arith.constant 0 : i32
    %c0_i32_1 = arith.constant 0 : i32
    return %c0_i32, %c0_i32_0 : i32, i32
  }
  func.func @transform_7(%arg0: i32) -> (i32, i32) {
    %c0_i32 = arith.constant 0 : i32
    %c0_i32_0 = arith.constant 0 : i32
    return %arg0, %c0_i32 : i32, i32
  }
}

</mosaic_0001>

<bundles_post_ra>
// kernel: tpu_custom_call.1
= control target key start
LH: loop header
LB: loop body
LE: loop exit
PB: predicated region body
PF: predicated region fallthrough
CT: control target
= control target key end

     0   :  { %12 = vsyncpa [#allocation3], 0  ;;  %s734_s0 = inlined_call_operand.hbm [shape: f32[8,64], index: 0, kind: input, shape index: {}]   ;;  %s735_s1 = inlined_call_operand.hbm [shape: f32[64,128], index: 1, kind: input, shape index: {}]   ;;  %s736_s2 = inlined_call_operand.vmem [shape: f32[1,128], index: 2, kind: input, shape index: {}]   ;;  %s737_s3 = inlined_call_operand.hbm [shape: f32[128,128], index: 3, kind: input, shape index: {}]   ;;  %s738_s4 = inlined_call_operand.vmem [shape: f32[1,128], index: 4, kind: input, shape index: {}]   ;;  %s739_s5 = inlined_call_operand.hbm [shape: f32[128,128], index: 5, kind: input, shape index: {}]   ;;  %s740_s6 = inlined_call_operand.vmem [shape: f32[1,128], index: 6, kind: input, shape index: {}]   ;;  %s741_s7 = inlined_call_operand.vmem [shape: f32[8,1], index: 7, kind: output, shape index: {}]  }
   0x1   :  { %13 = vsyncpa [#allocation5], 0 }
   0x2   :  { %14 = vsyncpa [#allocation8], 0  ;;  %s607_s24 = smov [#allocation4]  }
   0x3   :  { %s30_s25 = sshll.u32 %s607_s24, 4  ;;  %s31_s25 = int_to_ptr.vmem [resolvable:$true] %s30_s25 }
   0x4   :  { %s529_s26 = scalar_lea.vmem %s31_s25, 1024  ;;  %p534_p1 = scmp.lt.s32.totalorder %s31_s25, %s31_s25 }
   0x5   :  { %p530_p0 = scmp.ne.s32.totalorder %s31_s25, %s529_s26  ;;  %p535_p2 = scmp.lt.s32.totalorder %s529_s26, %s529_s26 }
   0x7   :  { %p536_p3 = por %p535_p2, %p534_p1 }
   0x9   :  { %p537_p4 = pnand %p536_p3, %p530_p0 }
   0xb   :  { %540 = shalt.err (!%p537_p4)
}
   0xc   :  { %s608_s27 = smov 128   ;;  %s609_s28 = smov 8  }
   0xd   :  { %36 = dma.hbm_to_vmem [thread:$0]  %s735_s1, 1024, %s31_s25, [#allocation5], %s608_s27, %s608_s27, %s609_s28  }
   0xe   :  { %s610_s8 = smov [#allocation2]   ;;  %s611_s10 = smov [#allocation6]  }
   0xf   :  { %s21_s9 = sshll.u32 %s610_s8, 4  ;;  %s44_s11 = sshll.u32 %s611_s10, 4  ;;  %s22_s9 = int_to_ptr.vmem [resolvable:$true] %s21_s9  ;;  %s45_s11 = int_to_ptr.vmem [resolvable:$true] %s44_s11 }
  0x10   :  { %s549_s12 = scalar_lea.vmem %s22_s9, 128  ;;  %p554_p6 = scmp.lt.s32.totalorder %s22_s9, %s22_s9 }
  0x11   :  { %p550_p5 = scmp.ne.s32.totalorder %s22_s9, %s549_s12  ;;  %p555_p7 = scmp.lt.s32.totalorder %s549_s12, %s549_s12 }
  0x13   :  { %p556_p8 = por %p555_p7, %p554_p6 }
  0x15   :  { %p557_p9 = pnand %p556_p8, %p550_p5 }
  0x17   :  { %560 = shalt.err (!%p557_p9)
}
  0x18   :  { %24 = dma.hbm_to_vmem [thread:$0]  %s734_s0, 128, %s22_s9, [#allocation3]  }
  0x19   :  { %s569_s15 = scalar_lea.vmem %s45_s11, 2048  ;;  %p574_p11 = scmp.lt.s32.totalorder %s45_s11, %s45_s11 }
  0x1a   :  { %p570_p10 = scmp.ne.s32.totalorder %s45_s11, %s569_s15  ;;  %p575_p12 = scmp.lt.s32.totalorder %s569_s15, %s569_s15 }
  0x1c   :  { %p576_p13 = por %p575_p12, %p574_p11 }
  0x1e   :  { %p577_p0 = pnand %p576_p13, %p570_p10 }
  0x20   :  { %580 = shalt.err (!%p577_p0)
}
  0x21   :  { %50 = dma.hbm_to_vmem [thread:$0]  %s737_s3, 2048, %s45_s11, [#allocation5], %s608_s27, %s608_s27, %s609_s28  }
  0x22   :  { %s612_s17 = smov [#allocation7]  }
  0x23   :  { %s58_s18 = sshll.u32 %s612_s17, 4  ;;  %s59_s18 = int_to_ptr.vmem [resolvable:$true] %s58_s18 }
  0x24   :  { %s589_s19 = scalar_lea.vmem %s59_s18, 2048  ;;  %p594_p2 = scmp.lt.s32.totalorder %s59_s18, %s59_s18 }
  0x25   :  { %p590_p1 = scmp.ne.s32.totalorder %s59_s18, %s589_s19  ;;  %p595_p3 = scmp.lt.s32.totalorder %s589_s19, %s589_s19 }
  0x27   :  { %p596_p4 = por %p595_p3, %p594_p2 }
  0x29   :  { %p597_p5 = pnand %p596_p4, %p590_p1 }
  0x2b   :  { %600 = shalt.err (!%p597_p5)
}
  0x2c   :  { %64 = dma.hbm_to_vmem [thread:$0]  %s739_s5, 2048, %s59_s18, [#allocation8], %s608_s27, %s608_s27, %s609_s28  }
  0x2d   :  { %601 = dma.done.wait [#allocation3], 128  }
  0x2e   :  { %602 = vsyncadd [#allocation3], 4294967168 }
  0x2f   :  { %603 = dma.done.wait [#allocation5], 3072  }
  0x30   :  { %604 = vsyncadd [#allocation5], 4294964224 }
  0x31   :  { %605 = dma.done.wait [#allocation8], 2048  }
  0x32   :  { %606 = vsyncadd [#allocation8], 4294965248  ;;  %v613_v0 = vmov 0.0   ;;  %vm614_vm0 = vmmov 0   ;;  %v86_v1 = vld [vmem:[#allocation4 + $0x38] sm:$0xff]  ;;  %v85_v2 = vld [vmem:[#allocation4 + $0x30] sm:$0xff] }
  0x33   :  { %420 = vmatprep.subr.mxu0 %v613_v0  ;;  %436 = vmatprep.mubr.msk.f32.mxu0 %vm614_vm0, %v613_v0  ;;  %v84_v3 = vld [vmem:[#allocation4 + $0x28] sm:$0xff]  ;;  %v103_v4 = vld [vmem:[#allocation6 + $0x78] sm:$0xff]  ;;  %v102_v5 = vld [vmem:[#allocation6 + $0x70] sm:$0xff]  ;;  %vm129_vm1 = vcmask 523264   ;;  %vm363_vm2 = vcmask 7168  }
  0x34   :  { %439 = vmatprep.subr.mxu1 %v613_v0  ;;  %471 = vmatprep.mubr.msk.f32.mxu1 %vm614_vm0, %v613_v0  ;;  %v83_v6 = vld [vmem:[#allocation4 + $0x20] sm:$0xff]  ;;  %v101_v7 = vld [vmem:[#allocation6 + $0x68] sm:$0xff]  ;;  %v82_v8 = vld [vmem:[#allocation4 + $0x18] sm:$0xff] }
  0x35   :  { %421 = vmatpush3.msra.mxu0 %v86_v1  ;;  %440 = vmatpush3.msra.mxu1 %v103_v4  ;;  %v100_v9 = vld [vmem:[#allocation6 + $0x60] sm:$0xff]  ;;  %v81_v10 = vld [vmem:[#allocation4 + $0x10] sm:$0xff]  ;;  %v99_v11 = vld [vmem:[#allocation6 + $0x58] sm:$0xff] }
  0x36   :  { %422 = vmatprep.subr.mxu0 %v613_v0  ;;  %441 = vmatprep.subr.mxu1 %v613_v0  ;;  %v80_v12 = vld [vmem:[#allocation4 + $0x8] sm:$0xff]  ;;  %v98_v13 = vld [vmem:[#allocation6 + $0x50] sm:$0xff]  ;;  %v79_v14 = vld [vmem:[#allocation4] sm:$0xff] }
  0x37   :  { %423 = vmatpush3.msra.mxu0 %v85_v2  ;;  %442 = vmatpush3.msra.mxu1 %v102_v5  ;;  %v122_v15 = vld [vmem:[#allocation2] sm:$0xff]  ;;  %v97_v16 = vld [vmem:[#allocation6 + $0x48] sm:$0xff]  ;;  %v96_v17 = vld [vmem:[#allocation6 + $0x40] sm:$0xff] }
  0x38   :  { %424 = vmatprep.subr.mxu0 %v613_v0  ;;  %443 = vmatprep.subr.mxu1 %v613_v0  ;;  %v95_v18 = vld [vmem:[#allocation6 + $0x38] sm:$0xff]  ;;  %v94_v19 = vld [vmem:[#allocation6 + $0x30] sm:$0xff]  ;;  %v93_v20 = vld [vmem:[#allocation6 + $0x28] sm:$0xff] }
  0x39   :  { %425 = vmatpush3.msra.mxu0 %v84_v3  ;;  %444 = vmatpush3.msra.mxu1 %v101_v7  ;;  %v92_v21 = vld [vmem:[#allocation6 + $0x20] sm:$0xff]  ;;  %v91_v22 = vld [vmem:[#allocation6 + $0x18] sm:$0xff]  ;;  %v90_v23 = vld [vmem:[#allocation6 + $0x10] sm:$0xff] }
  0x3a   :  { %426 = vmatprep.subr.mxu0 %v613_v0  ;;  %445 = vmatprep.subr.mxu1 %v613_v0  ;;  %v89_v24 = vld [vmem:[#allocation6 + $0x8] sm:$0xff]  ;;  %v88_v25 = vld [vmem:[#allocation6] sm:$0xff]  ;;  %v120_v26 = vld [vmem:[#allocation7 + $0x78] sm:$0xff] }
  0x3b   :  { %427 = vmatpush3.msra.mxu0 %v83_v6  ;;  %446 = vmatpush3.msra.mxu1 %v100_v9  ;;  %v119_v27 = vld [vmem:[#allocation7 + $0x70] sm:$0xff]  ;;  %v118_v28 = vld [vmem:[#allocation7 + $0x68] sm:$0xff]  ;;  %v117_v29 = vld [vmem:[#allocation7 + $0x60] sm:$0xff] }
  0x3c   :  { %428 = vmatprep.subr.mxu0 %v613_v0  ;;  %447 = vmatprep.subr.mxu1 %v613_v0  ;;  %v116_v30 = vld [vmem:[#allocation7 + $0x58] sm:$0xff]  ;;  %v115_v31 = vld [vmem:[#allocation7 + $0x50] sm:$0xff]  ;;  %v114_v32 = vld [vmem:[#allocation7 + $0x48] sm:$0xff] }
  0x3d   :  { %429 = vmatpush3.msra.mxu0 %v82_v8  ;;  %448 = vmatpush3.msra.mxu1 %v99_v11  ;;  %v113_v33 = vld [vmem:[#allocation7 + $0x40] sm:$0xff]  ;;  %v112_v34 = vld [vmem:[#allocation7 + $0x38] sm:$0xff]  ;;  %v111_v35 = vld [vmem:[#allocation7 + $0x30] sm:$0xff] }
  0x3e   :  { %430 = vmatprep.subr.mxu0 %v613_v0  ;;  %449 = vmatprep.subr.mxu1 %v613_v0  ;;  %v110_v36 = vld [vmem:[#allocation7 + $0x28] sm:$0xff]  ;;  %v109_v37 = vld [vmem:[#allocation7 + $0x20] sm:$0xff]  ;;  %v108_v38 = vld [vmem:[#allocation7 + $0x18] sm:$0xff] }
  0x3f   :  { %431 = vmatpush3.msra.mxu0 %v81_v10  ;;  %450 = vmatpush3.msra.mxu1 %v98_v13  ;;  %v372_v39 = vld [vmem:[%s736_s2] ss:$0 sm:$0xff]  ;;  %v107_v44 = vld [vmem:[#allocation7 + $0x10] sm:$0xff]  ;;  %v106_v45 = vld [vmem:[#allocation7 + $0x8] sm:$0xff] }
  0x40   :  { %432 = vmatprep.subr.mxu0 %v613_v0  ;;  %451 = vmatprep.subr.mxu1 %v613_v0  ;;  %v105_v46 = vld [vmem:[#allocation7] sm:$0xff]  ;;  %v374_v47 = vld [vmem:[%s738_s4] ss:$0 sm:$0xff] }
  0x41   :  { %433 = vmatpush3.msra.mxu0 %v80_v12  ;;  %452 = vmatpush3.msra.mxu1 %v97_v16  ;;  %v375_v52 = vld [vmem:[%s740_s6] ss:$0 sm:$0xff] }
  0x42   :  { %434 = vmatprep.subr.mxu0 %v613_v0  ;;  %453 = vmatprep.subr.mxu1 %v613_v0 }
  0x43   :  { %435 = vmatpush3.msra.mxu0 %v79_v14  ;;  %454 = vmatpush3.msra.mxu1 %v96_v17 }
  0x44   :  { %437 = vmatmul.mubr.msk.f32.vlgmr.msra.gmra.mxu0 %vm129_vm1, %v122_v15  ;;  %474 = vmatprep.subr.mxu0 %v613_v0 }
  0x45   :  { %506 = vmatprep.mubr.msk.f32.mxu0 %vm614_vm0, %v613_v0  ;;  %455 = vmatprep.subr.mxu1 %v613_v0 }
  0x46   :  { %456 = vmatpush3.msra.mxu1 %v95_v18  ;;  %475 = vmatpush3.msra.mxu0 %v120_v26 }
  0x47   :  { %457 = vmatprep.subr.mxu1 %v613_v0  ;;  %476 = vmatprep.subr.mxu0 %v613_v0 }
  0x48   :  { %458 = vmatpush3.msra.mxu1 %v94_v19  ;;  %477 = vmatpush3.msra.mxu0 %v119_v27 }
  0x49   :  { %459 = vmatprep.subr.mxu1 %v613_v0  ;;  %478 = vmatprep.subr.mxu0 %v613_v0 }
  0x4a   :  { %460 = vmatpush3.msra.mxu1 %v93_v20  ;;  %479 = vmatpush3.msra.mxu0 %v118_v28 }
  0x4b   :  { %461 = vmatprep.subr.mxu1 %v613_v0  ;;  %480 = vmatprep.subr.mxu0 %v613_v0 }
  0x4c   :  { %462 = vmatpush3.msra.mxu1 %v92_v21  ;;  %481 = vmatpush3.msra.mxu0 %v117_v29 }
  0x4d   :  { %463 = vmatprep.subr.mxu1 %v613_v0  ;;  %482 = vmatprep.subr.mxu0 %v613_v0 }
  0x4e   :  { %464 = vmatpush3.msra.mxu1 %v91_v22  ;;  %483 = vmatpush3.msra.mxu0 %v116_v30 }
  0x4f   :  { %465 = vmatprep.subr.mxu1 %v613_v0  ;;  %484 = vmatprep.subr.mxu0 %v613_v0 }
  0x50   :  { %466 = vmatpush3.msra.mxu1 %v90_v23  ;;  %485 = vmatpush3.msra.mxu0 %v115_v31 }
  0x51   :  { %467 = vmatprep.subr.mxu1 %v613_v0  ;;  %486 = vmatprep.subr.mxu0 %v613_v0 }
  0x52   :  { %468 = vmatpush3.msra.mxu1 %v89_v24  ;;  %487 = vmatpush3.msra.mxu0 %v114_v32 }
  0x53   :  { %469 = vmatprep.subr.mxu1 %v613_v0  ;;  %488 = vmatprep.subr.mxu0 %v613_v0 }
  0x54   :  { %470 = vmatpush3.msra.mxu1 %v88_v25  ;;  %489 = vmatpush3.msra.mxu0 %v113_v33 }
  0x55   :  { %490 = vmatprep.subr.mxu0 %v613_v0 }
  0x56   :  { %491 = vmatpush3.msra.mxu0 %v112_v34 }
  0x57   :  { %492 = vmatprep.subr.mxu0 %v613_v0 }
  0x58   :  { %493 = vmatpush3.msra.mxu0 %v111_v35 }
  0x59   :  { %494 = vmatprep.subr.mxu0 %v613_v0 }
  0x5a   :  { %495 = vmatpush3.msra.mxu0 %v110_v36 }
  0x5b   :  { %496 = vmatprep.subr.mxu0 %v613_v0 }
  0x5c   :  { %497 = vmatpush3.msra.mxu0 %v109_v37 }
  0x5d   :  { %498 = vmatprep.subr.mxu0 %v613_v0 }
  0x5e   :  { %499 = vmatpush3.msra.mxu0 %v108_v38 }
  0x5f   :  { %500 = vmatprep.subr.mxu0 %v613_v0 }
  0x60   :  { %501 = vmatpush3.msra.mxu0 %v107_v44 }
  0x61   :  { %502 = vmatprep.subr.mxu0 %v613_v0 }
  0x62   :  { %503 = vmatpush3.msra.mxu0 %v106_v45 }
  0x63   :  { %504 = vmatprep.subr.mxu0 %v613_v0 }
  0x64   :  { %505 = vmatpush3.msra.mxu0 %v105_v46 }
 0x104   :  { %v199_v40 = vpop.f32.mrf.mxu0 }
 0x105   :  { %v200_v41 = vadd.f32 %v372_v39, %v199_v40 }
 0x106   :  { %v438_v42 = vpop.f32.mrf.mxu0 }
 0x107   :  { %v203_v43 = vmax.f32 %v200_v41, 0.0 }
 0x109   :  { %472 = vmatmul.mubr.f32.vlgmr.msra.gmra.mxu1 %v203_v43 }
 0x1c9   :  { %v276_v48 = vpop.f32.mrf.mxu1 }
 0x1ca   :  { %v277_v49 = vadd.f32 %v374_v47, %v276_v48 }
 0x1cb   :  { %v473_v50 = vpop.f32.mrf.mxu1 }
 0x1cc   :  { %v280_v51 = vmax.f32 %v277_v49, 0.0 }
 0x1ce   :  { %507 = vmatmul.mubr.f32.vlgmr.msra.gmra.mxu0 %v280_v51 }
 0x28e   :  { %v353_v53 = vpop.f32.mrf.mxu0 }
 0x28f   :  { %v354_v54 = vadd.f32 %v375_v52, %v353_v53 }
 0x290   :  { %v508_v55 = vpop.f32.mrf.mxu0 }
 0x291   :  { %v376_v56 = vmul.f32 -1.442695, %v354_v54 }
 0x293   :  { %517 = vpow2.f32 %v376_v56 }
 0x2a0   :  { %v518_v57 = vpop.eup %517 }
 0x2a1   :  { %v360_v58 = vadd.f32 1.0, %v518_v57 }
 0x2a3   :  { %519 = vrcp.f32 %v360_v58 }
 0x2b0   :  { %v520_v59 = vpop.eup %519 }
 0x2b1   :  { %364 = vst.msk [vmem:[%s741_s7] sm:$0xff] %vm363_vm2, %v520_v59 }
 0x2b2   :  { %369 = vsyncpa [#allocation3], 1 }
 0x2b3   :  { %370 = vsyncpa [#allocation5], 1 }
 0x2b4   :  { %371 = vsyncpa [#allocation8], 1 }

</bundles_post_ra>
